<compile_context>
chip_gen: v6e
topology: v6e:2x2x1
jax: 0.10.0
libtpu: 0.0.40
codegen_flags: <defaults>
</compile_context>

<pallas_src>
import jax
import jax.numpy as jnp
from jax.experimental import pallas as pl
from jax.experimental.pallas import tpu as pltpu


IN_DIM = 3
HIDDEN1 = 256
HIDDEN2 = 64
OUT_DIM = 2

# Lane-dense padded sizes (TPU vreg lane width = 128).
H2_PAD = 128       # HIDDEN2 (64) zero-padded to a full lane group
OUT_PAD = 128      # OUT_DIM (2) zero-padded so the output store is unmasked


def _round_up(n, m):
    return ((n + m - 1) // m) * m


def qnet_kernel(x_ref, w1_ref, b1_ref, w2_ref, b2_ref, w3_ref, b3_ref, o_ref):
    x = x_ref[...]               # (TILE_B, 3)   f32
    w1 = w1_ref[...]             # (3, 256)      f32

    # Layer 1: Linear(3, 256) + ReLU.  K=3 is far too shallow for the MXU,
    # so use three broadcast multiply-adds on the VPU instead.
    h1 = (x[:, 0:1] * w1[0:1, :]
          + x[:, 1:2] * w1[1:2, :]
          + x[:, 2:3] * w1[2:3, :]
          + b1_ref[...])
    h1 = jnp.maximum(h1, 0.0)    # (TILE_B, 256) f32

    # Layer 2: Linear(256, 64 -> 128-padded) + ReLU on the MXU, f32 accum.
    h2 = jnp.dot(h1, w2_ref[...], preferred_element_type=jnp.float32)
    h2 = jnp.maximum(h2 + b2_ref[...], 0.0)      # (TILE_B, 128) f32

    # Layer 3: Linear(64 -> 128-padded, 2 -> 128-padded), raw Q-values.
    # Padded zero rows/cols contribute exactly zero; lane-dense output store.
    out = jnp.dot(h2, w3_ref[...], preferred_element_type=jnp.float32)
    o_ref[...] = (out + b3_ref[...]).astype(o_ref.dtype)


def prepare_params(params):
    """One-time conversion of PyTorch-equivalent params to kernel layout.

    Zero-pads hidden2/output to 128 lanes; do this once, outside the
    per-step forward path.
    """
    f32 = jnp.float32
    return {
        "w1": params["w1"].astype(f32),                                   # (3, 256)
        "b1": params["b1"].reshape(1, HIDDEN1).astype(f32),               # (1, 256)
        "w2": jnp.pad(params["w2"].astype(f32),
                      ((0, 0), (0, H2_PAD - HIDDEN2))),                   # (256, 128)
        "b2": jnp.pad(params["b2"].reshape(1, HIDDEN2).astype(f32),
                      ((0, 0), (0, H2_PAD - HIDDEN2))),                   # (1, 128)
        "w3": jnp.pad(params["w3"].astype(f32),
                      ((0, H2_PAD - HIDDEN2), (0, OUT_PAD - OUT_DIM))),   # (128, 128)
        "b3": jnp.pad(params["b3"].reshape(1, OUT_DIM).astype(f32),
                      ((0, 0), (0, OUT_PAD - OUT_DIM))),                  # (1, 128)
    }


def qnet_forward(x, kp, *, tile_b=512):
    """x: (B, 3) float32.  kp: prepare_params(...) output.  Returns (B, 2)."""
    B = x.shape[0]
    tile_b = min(tile_b, _round_up(max(B, 1), 8))   # keep tiny batches cheap
    b_pad = _round_up(B, tile_b)
    grid = (b_pad // tile_b,)

    if b_pad != B:
        x = jnp.pad(x, ((0, b_pad - B), (0, 0)))

    const = lambda shape: pl.BlockSpec(shape, lambda i: (0, 0))

    flops = 2 * b_pad * (IN_DIM * HIDDEN1 + HIDDEN1 * H2_PAD + H2_PAD * OUT_PAD)
    bytes_accessed = (b_pad * IN_DIM * 4 + b_pad * OUT_PAD * 4
                      + sum(int(v.size) * 4 for v in kp.values()))

    out_padded = pl.pallas_call(
        qnet_kernel,
        out_shape=jax.ShapeDtypeStruct((b_pad, OUT_PAD), jnp.float32),
        grid=grid,
        in_specs=[
            pl.BlockSpec((tile_b, IN_DIM), lambda i: (i, 0)),  # x: tiled over batch
            const((IN_DIM, HIDDEN1)),      # weights/biases: constant index_map,
            const((1, HIDDEN1)),           # DMA'd once, resident across steps
            const((HIDDEN1, H2_PAD)),
            const((1, H2_PAD)),
            const((H2_PAD, OUT_PAD)),
            const((1, OUT_PAD)),
        ],
        out_specs=pl.BlockSpec((tile_b, OUT_PAD), lambda i: (i, 0)),
        compiler_params=pltpu.CompilerParams(
            dimension_semantics=("parallel",)),   # batch tiles are independent
        cost_estimate=pl.CostEstimate(
            flops=flops, transcendentals=0, bytes_accessed=bytes_accessed),
    )(x, kp["w1"], kp["b1"], kp["w2"], kp["b2"], kp["w3"], kp["b3"])

    return out_padded[:B, :OUT_DIM]


def init_params(key):
    """Deterministic init matching PyTorch Linear shapes.

    PyTorch stores W as (out, in); we store the transpose (in, out) so the
    kernel computes x @ W directly.
    """
    k1, k2, k3, k4, k5, k6 = jax.random.split(key, 6)

    def uniform(k, shape, fan_in):
        bound = 1.0 / jnp.sqrt(fan_in)
        return jax.random.uniform(k, shape, jnp.float32, -bound, bound)

    return {
        "w1": uniform(k1, (IN_DIM, HIDDEN1), IN_DIM),
        "b1": uniform(k2, (1, HIDDEN1), IN_DIM),
        "w2": uniform(k3, (HIDDEN1, HIDDEN2), HIDDEN1),
        "b2": uniform(k4, (1, HIDDEN2), HIDDEN1),
        "w3": uniform(k5, (HIDDEN2, OUT_DIM), HIDDEN2),
        "b3": uniform(k6, (1, OUT_DIM), HIDDEN2),
    }


def preprocess(state):
    """JAX / jit-safe equivalent of the PyTorch preprocess()."""
    player, dealer, ace = state
    usable_ace = jnp.where(jnp.asarray(ace, jnp.bool_),
                           jnp.float32(1.0), jnp.float32(-1.0))
    return jnp.stack([jnp.asarray(player, jnp.float32),
                      jnp.asarray(dealer, jnp.float32),
                      usable_ace.astype(jnp.float32)])


def _reference_forward(x, p):
    """Plain-JAX f32 reference, identical math to the PyTorch module."""
    hi = jax.lax.Precision.HIGHEST
    h1 = jnp.maximum(jnp.dot(x, p["w1"], precision=hi) + p["b1"], 0.0)
    h2 = jnp.maximum(jnp.dot(h1, p["w2"], precision=hi) + p["b2"], 0.0)
    return jnp.dot(h2, p["w3"], precision=hi) + p["b3"]


# TODO(synk): select_act's epsilon-greedy sampling, the Adam optimizer,
# smooth_l1_loss and the per-episode training loop are host-side RL control
# logic with no Pallas equivalent; only the forward pass is implemented here.


if __name__ == "__main__":
    key = jax.random.PRNGKey(0)
    pkey, _ = jax.random.split(key)
    params = init_params(pkey)
    kparams = prepare_params(params)          # kernel-layout params, built once

    # Small batch of preprocessed blackjack states: (player_sum, dealer, ±1 ace)
    batch = 8
    x = jnp.stack([
        preprocess((14 + (i % 7), 1 + (i % 10), i % 2 == 0)) for i in range(batch)
    ])  # (8, 3) float32

    fwd = jax.jit(qnet_forward)
    out = jax.block_until_ready(fwd(x, kparams))

    ref = _reference_forward(x, params)
    assert out.shape == (batch, OUT_DIM)
    assert jnp.allclose(out, ref, atol=2e-3, rtol=2e-3), float(
        jnp.max(jnp.abs(out - ref)))

    print("KERNEL_OK")
</pallas_src>

<mosaic_0001>
module attributes {stable_mosaic.version = 11 : i64} {
  func.func @qnet_kernel(%arg0: i32, %arg1: memref<8x3xf32, #tpu.memory_space<vmem>>, %arg2: memref<3x256xf32, #tpu.memory_space<vmem>>, %arg3: memref<1x256xf32, #tpu.memory_space<vmem>>, %arg4: memref<256x128xf32, #tpu.memory_space<vmem>>, %arg5: memref<1x128xf32, #tpu.memory_space<vmem>>, %arg6: memref<128x128xf32, #tpu.memory_space<vmem>>, %arg7: memref<1x128xf32, #tpu.memory_space<vmem>>, %arg8: memref<8x128xf32, #tpu.memory_space<vmem>>) attributes {dimension_semantics = [#tpu.dimension_semantics<parallel>], iteration_bounds = array<i64: 1>, scalar_prefetch = 0 : i64, scratch_operands = 0 : i64, tpu.core_type = #tpu.core_type<tc>, window_params = [{transform_indices = @transform_0, window_bounds = array<i64: 8, 3>}, {pipeline_mode = #tpu.pipeline_mode<synchronous>, transform_indices = @transform_1, window_bounds = array<i64: 3, 256>}, {pipeline_mode = #tpu.pipeline_mode<synchronous>, transform_indices = @transform_2, window_bounds = array<i64: 1, 256>}, {pipeline_mode = #tpu.pipeline_mode<synchronous>, transform_indices = @transform_3, window_bounds = array<i64: 256, 128>}, {pipeline_mode = #tpu.pipeline_mode<synchronous>, transform_indices = @transform_4, window_bounds = array<i64: 1, 128>}, {pipeline_mode = #tpu.pipeline_mode<synchronous>, transform_indices = @transform_5, window_bounds = array<i64: 128, 128>}, {pipeline_mode = #tpu.pipeline_mode<synchronous>, transform_indices = @transform_6, window_bounds = array<i64: 1, 128>}, {transform_indices = @transform_7, window_bounds = array<i64: 8, 128>}]} {
    %c0 = arith.constant 0 : index
    %c0_0 = arith.constant 0 : index
    %0 = vector.load %arg1[%c0, %c0_0] : memref<8x3xf32, #tpu.memory_space<vmem>>, vector<8x3xf32>
    %c0_1 = arith.constant 0 : index
    %c0_2 = arith.constant 0 : index
    %1 = vector.load %arg2[%c0_1, %c0_2] : memref<3x256xf32, #tpu.memory_space<vmem>>, vector<3x256xf32>
    %2 = vector.extract_strided_slice %0 {offsets = [0, 0], sizes = [8, 1], strides = [1, 1]} : vector<8x3xf32> to vector<8x1xf32>
    %3 = vector.extract_strided_slice %1 {offsets = [0, 0], sizes = [1, 256], strides = [1, 1]} : vector<3x256xf32> to vector<1x256xf32>
    %4 = vector.broadcast %2 : vector<8x1xf32> to vector<8x256xf32>
    %5 = vector.broadcast %3 : vector<1x256xf32> to vector<8x256xf32>
    %6 = arith.mulf %4, %5 : vector<8x256xf32>
    %7 = vector.extract_strided_slice %0 {offsets = [0, 1], sizes = [8, 1], strides = [1, 1]} : vector<8x3xf32> to vector<8x1xf32>
    %8 = vector.extract_strided_slice %1 {offsets = [1, 0], sizes = [1, 256], strides = [1, 1]} : vector<3x256xf32> to vector<1x256xf32>
    %9 = vector.broadcast %7 : vector<8x1xf32> to vector<8x256xf32>
    %10 = vector.broadcast %8 : vector<1x256xf32> to vector<8x256xf32>
    %11 = arith.mulf %9, %10 : vector<8x256xf32>
    %12 = arith.addf %6, %11 : vector<8x256xf32>
    %13 = vector.extract_strided_slice %0 {offsets = [0, 2], sizes = [8, 1], strides = [1, 1]} : vector<8x3xf32> to vector<8x1xf32>
    %14 = vector.extract_strided_slice %1 {offsets = [2, 0], sizes = [1, 256], strides = [1, 1]} : vector<3x256xf32> to vector<1x256xf32>
    %15 = vector.broadcast %13 : vector<8x1xf32> to vector<8x256xf32>
    %16 = vector.broadcast %14 : vector<1x256xf32> to vector<8x256xf32>
    %17 = arith.mulf %15, %16 : vector<8x256xf32>
    %18 = arith.addf %12, %17 : vector<8x256xf32>
    %c0_3 = arith.constant 0 : index
    %c0_4 = arith.constant 0 : index
    %19 = vector.load %arg3[%c0_3, %c0_4] : memref<1x256xf32, #tpu.memory_space<vmem>>, vector<1x256xf32>
    %20 = vector.broadcast %19 : vector<1x256xf32> to vector<8x256xf32>
    %21 = arith.addf %18, %20 : vector<8x256xf32>
    %cst = arith.constant 0.000000e+00 : f32
    %22 = vector.broadcast %cst : f32 to vector<8x256xf32>
    %23 = arith.maximumf %21, %22 : vector<8x256xf32>
    %c0_5 = arith.constant 0 : index
    %c0_6 = arith.constant 0 : index
    %24 = vector.load %arg4[%c0_5, %c0_6] : memref<256x128xf32, #tpu.memory_space<vmem>>, vector<256x128xf32>
    %cst_7 = arith.constant dense<0.000000e+00> : vector<8x128xf32>
    %25 = tpu.matmul %23, %24, %cst_7 {dimension_numbers = #tpu.dot_dimension_numbers<[1], [0], [0], [1], [0, 0, 1, 1], [], []>} : vector<8x256xf32>, vector<256x128xf32>, vector<8x128xf32> -> vector<8x128xf32>
    %c0_8 = arith.constant 0 : index
    %c0_9 = arith.constant 0 : index
    %26 = vector.load %arg5[%c0_8, %c0_9] : memref<1x128xf32, #tpu.memory_space<vmem>>, vector<1x128xf32>
    %27 = vector.broadcast %26 : vector<1x128xf32> to vector<8x128xf32>
    %28 = arith.addf %25, %27 : vector<8x128xf32>
    %cst_10 = arith.constant 0.000000e+00 : f32
    %29 = vector.broadcast %cst_10 : f32 to vector<8x128xf32>
    %30 = arith.maximumf %28, %29 : vector<8x128xf32>
    %c0_11 = arith.constant 0 : index
    %c0_12 = arith.constant 0 : index
    %31 = vector.load %arg6[%c0_11, %c0_12] : memref<128x128xf32, #tpu.memory_space<vmem>>, vector<128x128xf32>
    %cst_13 = arith.constant dense<0.000000e+00> : vector<8x128xf32>
    %32 = tpu.matmul %30, %31, %cst_13 {dimension_numbers = #tpu.dot_dimension_numbers<[1], [0], [0], [1], [0, 0, 1, 1], [], []>} : vector<8x128xf32>, vector<128x128xf32>, vector<8x128xf32> -> vector<8x128xf32>
    %c0_14 = arith.constant 0 : index
    %c0_15 = arith.constant 0 : index
    %33 = vector.load %arg7[%c0_14, %c0_15] : memref<1x128xf32, #tpu.memory_space<vmem>>, vector<1x128xf32>
    %34 = vector.broadcast %33 : vector<1x128xf32> to vector<8x128xf32>
    %35 = arith.addf %32, %34 : vector<8x128xf32>
    %c0_16 = arith.constant 0 : index
    %c0_17 = arith.constant 0 : index
    %36 = vector.load %arg8[%c0_16, %c0_17] : memref<8x128xf32, #tpu.memory_space<vmem>>, vector<8x128xf32>
    tpu.vector_store %arg8[%c0_16, %c0_17], %35 {strides = array<i32>} : memref<8x128xf32, #tpu.memory_space<vmem>>, vector<8x128xf32>,
    return
  }
  func.func @transform_0(%arg0: i32) -> (i32, i32) {
    %c0_i32 = arith.constant 0 : i32
    %c0_i32_0 = arith.constant 0 : i32
    return %arg0, %c0_i32 : i32, i32
  }
  func.func @transform_1(%arg0: i32) -> (i32, i32) {
    %c0_i32 = arith.constant 0 : i32
    %c0_i32_0 = arith.constant 0 : i32
    %c0_i32_1 = arith.constant 0 : i32
    return %c0_i32, %c0_i32_0 : i32, i32
  }
  func.func @transform_2(%arg0: i32) -> (i32, i32) {
    %c0_i32 = arith.constant 0 : i32
    %c0_i32_0 = arith.constant 0 : i32
    %c0_i32_1 = arith.constant 0 : i32
    return %c0_i32, %c0_i32_0 : i32, i32
  }
  func.func @transform_3(%arg0: i32) -> (i32, i32) {
    %c0_i32 = arith.constant 0 : i32
    %c0_i32_0 = arith.constant 0 : i32
    %c0_i32_1 = arith.constant 0 : i32
    return %c0_i32, %c0_i32_0 : i32, i32
  }
  func.func @transform_4(%arg0: i32) -> (i32, i32) {
    %c0_i32 = arith.constant 0 : i32
    %c0_i32_0 = arith.constant 0 : i32
    %c0_i32_1 = arith.constant 0 : i32
    return %c0_i32, %c0_i32_0 : i32, i32
  }
  func.func @transform_5(%arg0: i32) -> (i32, i32) {
    %c0_i32 = arith.constant 0 : i32
    %c0_i32_0 = arith.constant 0 : i32
    %c0_i32_1 = arith.constant 0 : i32
    return %c0_i32, %c0_i32_0 : i32, i32
  }
  func.func @transform_6(%arg0: i32) -> (i32, i32) {
    %c0_i32 = arith.constant 0 : i32
    %c0_i32_0 = arith.constant 0 : i32
    %c0_i32_1 = arith.constant 0 : i32
    return %c0_i32, %c0_i32_0 : i32, i32
  }
  func.func @transform_7(%arg0: i32) -> (i32, i32) {
    %c0_i32 = arith.constant 0 : i32
    %c0_i32_0 = arith.constant 0 : i32
    return %arg0, %c0_i32 : i32, i32
  }
}

</mosaic_0001>

<bundles_post_ra>
// kernel: qnet_forward.1
= control target key start
LH: loop header
LB: loop body
LE: loop exit
PB: predicated region body
PF: predicated region fallthrough
CT: control target
= control target key end

     0   :  { %12 = vsyncpa [#allocation3], 0  ;;  %s596_s0 = inlined_call_operand.vmem [shape: f32[8,3], index: 0, kind: input, shape index: {}]   ;;  %s597_s1 = inlined_call_operand.vmem [shape: f32[3,256], index: 1, kind: input, shape index: {}]   ;;  %s598_s2 = inlined_call_operand.vmem [shape: f32[1,256], index: 2, kind: input, shape index: {}]   ;;  %s599_s3 = inlined_call_operand.hbm [shape: f32[256,128], index: 3, kind: input, shape index: {}]   ;;  %s600_s4 = inlined_call_operand.vmem [shape: f32[1,128], index: 4, kind: input, shape index: {}]   ;;  %s601_s5 = inlined_call_operand.hbm [shape: f32[128,128], index: 5, kind: input, shape index: {}]   ;;  %s602_s6 = inlined_call_operand.vmem [shape: f32[1,128], index: 6, kind: input, shape index: {}]   ;;  %s603_s7 = inlined_call_operand.vmem [shape: f32[8,128], index: 7, kind: output, shape index: {}]  }
   0x1   :  { %13 = vsyncpa [#allocation5], 0  ;;  %s506_s24 = smov [#allocation2]  }
   0x2   :  { %s25_s25 = sshll.u32 %s506_s24, 4  ;;  %s26_s25 = int_to_ptr.vmem [resolvable:$true] %s25_s25 }
   0x3   :  { %s470_s26 = scalar_lea.vmem %s26_s25, 4096  ;;  %p475_p1 = scmp.lt.s32.totalorder %s26_s25, %s26_s25 }
   0x4   :  { %p471_p0 = scmp.ne.s32.totalorder %s26_s25, %s470_s26  ;;  %p476_p2 = scmp.lt.s32.totalorder %s470_s26, %s470_s26 }
   0x6   :  { %p477_p3 = por %p476_p2, %p475_p1 }
   0x8   :  { %p478_p4 = pnand %p477_p3, %p471_p0 }
   0xa   :  { %481 = shalt.err (!%p478_p4)
}
   0xb   :  { %s507_s27 = smov 128   ;;  %s508_s28 = smov 8  }
   0xc   :  { %31 = dma.hbm_to_vmem [thread:$0]  %s599_s3, 4096, %s26_s25, [#allocation3], %s507_s27, %s507_s27, %s508_s28  }
   0xd   :  { %s509_s8 = smov [#allocation4]  }
   0xe   :  { %s39_s9 = sshll.u32 %s509_s8, 4  ;;  %s40_s9 = int_to_ptr.vmem [resolvable:$true] %s39_s9 }
   0xf   :  { %s490_s10 = scalar_lea.vmem %s40_s9, 2048  ;;  %p495_p6 = scmp.lt.s32.totalorder %s40_s9, %s40_s9 }
  0x10   :  { %p491_p5 = scmp.ne.s32.totalorder %s40_s9, %s490_s10  ;;  %p496_p7 = scmp.lt.s32.totalorder %s490_s10, %s490_s10 }
  0x12   :  { %p497_p8 = por %p496_p7, %p495_p6 }
  0x14   :  { %p498_p9 = pnand %p497_p8, %p491_p5 }
  0x16   :  { %501 = shalt.err (!%p498_p9)
}
  0x17   :  { %45 = dma.hbm_to_vmem [thread:$0]  %s601_s5, 2048, %s40_s9, [#allocation5], %s507_s27, %s507_s27, %s508_s28  }
  0x18   :  { %502 = dma.done.wait [#allocation3], 4096  }
  0x19   :  { %503 = vsyncadd [#allocation3], 4294963200 }
  0x1a   :  { %504 = dma.done.wait [#allocation5], 2048  }
  0x1b   :  { %505 = vsyncadd [#allocation5], 4294965248  ;;  %v510_v0 = vmov 0   ;;  %v511_v1 = vmov 2   ;;  %v54_v2 = vld [vmem:[%s596_s0] sm:$0xff]  ;;  %v181_v3 = vld [vmem:[#allocation2 + $0xf8] sm:$0xff]  ;;  %v62_v48 = vlaneseq }
  0x1c   :  { %458 = vset.pattern.permute.xlu0 %v510_v0  ;;  %460 = vset.pattern.permute.xlu1 %v511_v1  ;;  %v165_v4 = vld [vmem:[#allocation2 + $0x78] sm:$0xff]  ;;  %v180_v5 = vld [vmem:[#allocation2 + $0xf0] sm:$0xff]  ;;  %v179_v7 = vld [vmem:[#allocation2 + $0xe8] sm:$0xff]  ;;  %v512_v9 = vmov 1   ;;  %v513_v21 = vmov 0.0   ;;  %vm514_vm0 = vmmov 0  }
  0x1d   :  { %58 = vperm.xlu0 %458, %v54_v2   ;;  %109 = vperm.xlu1 %460, %v54_v2   ;;  %v164_v6 = vld [vmem:[#allocation2 + $0x70] sm:$0xff]  ;;  %v163_v8 = vld [vmem:[#allocation2 + $0x68] sm:$0xff]  ;;  %v178_v10 = vld [vmem:[#allocation2 + $0xe0] sm:$0xff]  ;;  %v63_v49 = vshrl.u32 %v62_v48, 7 }
  0x1e   :  { %362 = vmatprep.subr.mxu0 %v181_v3  ;;  %v162_v11 = vld [vmem:[#allocation2 + $0x60] sm:$0xff]  ;;  %v177_v12 = vld [vmem:[#allocation2 + $0xd8] sm:$0xff]  ;;  %v176_v14 = vld [vmem:[#allocation2 + $0xd0] sm:$0xff]  ;;  %414 = vmatprep.subr.mxu1 %v513_v21 }
  0x1f   :  { %363 = vmatpush3.msra.mxu0 %v165_v4  ;;  %v161_v13 = vld [vmem:[#allocation2 + $0x58] sm:$0xff]  ;;  %v160_v15 = vld [vmem:[#allocation2 + $0x50] sm:$0xff]  ;;  %v175_v16 = vld [vmem:[#allocation2 + $0xc8] sm:$0xff]  ;;  %v64_v50 = vsub.s32 0, %v63_v49  ;;  %v68_v51 = vsub.s32 4, %v63_v49  ;;  %v88_v53 = vsub.s32 1, %v63_v49  ;;  %446 = vmatprep.mubr.msk.f32.mxu1 %vm514_vm0, %v513_v21 }
  0x20   :  { %364 = vmatprep.subr.mxu0 %v180_v5  ;;  %v159_v17 = vld [vmem:[#allocation2 + $0x48] sm:$0xff]  ;;  %v174_v18 = vld [vmem:[#allocation2 + $0xc0] sm:$0xff]  ;;  %v275_v19 = vld [vmem:[#allocation4 + $0x78] sm:$0xff]  ;;  %v92_v54 = vsub.s32 5, %v63_v49  ;;  %v114_v55 = vsub.s32 2, %v63_v49  ;;  %v118_v56 = vsub.s32 6, %v63_v49 }
  0x21   :  { %459 = vset.pattern.permute.xlu0 %v512_v9  ;;  %365 = vmatpush3.msra.mxu0 %v164_v6  ;;  %v158_v20 = vld [vmem:[#allocation2 + $0x40] sm:$0xff]  ;;  %v274_v22 = vld [vmem:[#allocation4 + $0x70] sm:$0xff]  ;;  %v173_v23 = vld [vmem:[#allocation2 + $0xb8] sm:$0xff] }
  0x22   :  { %83 = vperm.xlu0 %459, %v54_v2   ;;  %366 = vmatprep.subr.mxu0 %v179_v7  ;;  %v157_v24 = vld [vmem:[#allocation2 + $0x38] sm:$0xff]  ;;  %v273_v25 = vld [vmem:[#allocation4 + $0x68] sm:$0xff]  ;;  %v172_v26 = vld [vmem:[#allocation2 + $0xb0] sm:$0xff] }
  0x23   :  { %367 = vmatpush3.msra.mxu0 %v163_v8  ;;  %415 = vmatpush3.msra.mxu1 %v275_v19  ;;  %v156_v27 = vld [vmem:[#allocation2 + $0x30] sm:$0xff]  ;;  %v272_v28 = vld [vmem:[#allocation4 + $0x60] sm:$0xff]  ;;  %v171_v29 = vld [vmem:[#allocation2 + $0xa8] sm:$0xff] }
  0x24   :  { %368 = vmatprep.subr.mxu0 %v178_v10  ;;  %416 = vmatprep.subr.mxu1 %v513_v21  ;;  %v155_v30 = vld [vmem:[#allocation2 + $0x28] sm:$0xff]  ;;  %v271_v31 = vld [vmem:[#allocation4 + $0x58] sm:$0xff]  ;;  %v170_v32 = vld [vmem:[#allocation2 + $0xa0] sm:$0xff] }
  0x25   :  { %369 = vmatpush3.msra.mxu0 %v162_v11  ;;  %417 = vmatpush3.msra.mxu1 %v274_v22  ;;  %v154_v33 = vld [vmem:[#allocation2 + $0x20] sm:$0xff]  ;;  %v270_v34 = vld [vmem:[#allocation4 + $0x50] sm:$0xff]  ;;  %v169_v35 = vld [vmem:[#allocation2 + $0x98] sm:$0xff] }
  0x26   :  { %370 = vmatprep.subr.mxu0 %v177_v12  ;;  %461 = vset.pattern.permute.xlu0 %v511_v1  ;;  %v153_v36 = vld [vmem:[#allocation2 + $0x18] sm:$0xff]  ;;  %v269_v37 = vld [vmem:[#allocation4 + $0x48] sm:$0xff]  ;;  %v168_v38 = vld [vmem:[#allocation2 + $0x90] sm:$0xff] }
  0x27   :  { %371 = vmatpush3.msra.mxu0 %v161_v13  ;;  %418 = vmatprep.subr.mxu1 %v513_v21  ;;  %v152_v39 = vld [vmem:[#allocation2 + $0x10] sm:$0xff]  ;;  %v268_v40 = vld [vmem:[#allocation4 + $0x40] sm:$0xff]  ;;  %v167_v41 = vld [vmem:[#allocation2 + $0x88] sm:$0xff] }
  0x28   :  { %372 = vmatprep.subr.mxu0 %v176_v14  ;;  %419 = vmatpush3.msra.mxu1 %v273_v25  ;;  %v151_v42 = vld [vmem:[#allocation2 + $0x8] sm:$0xff]  ;;  %v267_v43 = vld [vmem:[#allocation4 + $0x38] sm:$0xff]  ;;  %v166_v44 = vld [vmem:[#allocation2 + $0x80] sm:$0xff] }
  0x29   :  { %373 = vmatpush3.msra.mxu0 %v160_v15  ;;  %420 = vmatprep.subr.mxu1 %v513_v21  ;;  %v150_v45 = vld [vmem:[#allocation2] sm:$0xff]  ;;  %v266_v46 = vld [vmem:[#allocation4 + $0x30] sm:$0xff]  ;;  %v265_v47 = vld [vmem:[#allocation4 + $0x28] sm:$0xff] }
  0x2a   :  { %374 = vmatprep.subr.mxu0 %v175_v16  ;;  %421 = vmatpush3.msra.mxu1 %v272_v28  ;;  %v55_v52 = vld [vmem:[%s597_s1] sm:$0x77]  ;;  %v262_v28 = vld [vmem:[#allocation4 + $0x10] sm:$0xff] }
  0x2b   :  { %375 = vmatpush3.msra.mxu0 %v159_v17  ;;  %422 = vmatprep.subr.mxu1 %v513_v21  ;;  %v65_v57 = vrot.slane %v55_v52, %v64_v50  ;;  %v69_v58 = vrot.slane %v55_v52, %v68_v51  ;;  %v89_v59 = vrot.slane %v55_v52, %v88_v53  ;;  %v134_v10 = vld [vmem:[%s598_s2] sm:$0x3] }
  0x2c   :  { %376 = vmatprep.subr.mxu0 %v174_v18  ;;  %423 = vmatpush3.msra.mxu1 %v271_v31  ;;  %v93_v60 = vrot.slane %v55_v52, %v92_v54  ;;  %v115_v61 = vrot.slane %v55_v52, %v114_v55  ;;  %v119_v62 = vrot.slane %v55_v52, %v118_v56 }
  0x2d   :  { %377 = vmatpush3.msra.mxu0 %v158_v20  ;;  %424 = vmatprep.subr.mxu1 %v513_v21  ;;  %v75_v0 = vrot.slane %v65_v57, %v64_v50  ;;  %v79_v1 = vrot.slane %v69_v58, %v64_v50  ;;  %v99_v2 = vrot.slane %v89_v59, %v88_v53 }
  0x2e   :  { %378 = vmatprep.subr.mxu0 %v173_v23  ;;  %425 = vmatpush3.msra.mxu1 %v270_v34  ;;  %v103_v3 = vrot.slane %v93_v60, %v88_v53  ;;  %v125_v4 = vrot.slane %v115_v61, %v114_v55  ;;  %v129_v5 = vrot.slane %v119_v62, %v114_v55 }
  0x2f   :  { %379 = vmatpush3.msra.mxu0 %v157_v24  ;;  %426 = vmatprep.subr.mxu1 %v513_v21  ;;  %v139_v17 = vrot.slane %v134_v10, %v64_v50  ;;  %v143_v18 = vrot.slane %v134_v10, %v88_v53 }
  0x30   :  { %380 = vmatprep.subr.mxu0 %v172_v26  ;;  %427 = vmatpush3.msra.mxu1 %v269_v37  ;;  %v264_v26 = vld [vmem:[#allocation4 + $0x20] sm:$0xff] }
  0x31   :  { %381 = vmatpush3.msra.mxu0 %v156_v27  ;;  %428 = vmatprep.subr.mxu1 %v513_v21  ;;  %v263_v27 = vld [vmem:[#allocation4 + $0x18] sm:$0xff]  ;;  %v361_v37 = vld [vmem:[%s602_s6] ss:$0 sm:$0xff] }
  0x32   :  { %382 = vmatprep.subr.mxu0 %v171_v29  ;;  %429 = vmatpush3.msra.mxu1 %v268_v40  ;;  %v261_v29 = vld [vmem:[#allocation4 + $0x8] sm:$0xff] }
  0x33   :  { %383 = vmatpush3.msra.mxu0 %v155_v30  ;;  %430 = vmatprep.subr.mxu1 %v513_v21  ;;  %v260_v30 = vld [vmem:[#allocation4] sm:$0xff] }
  0x34   :  { %384 = vmatprep.subr.mxu0 %v170_v32  ;;  %431 = vmatpush3.msra.mxu1 %v267_v43  ;;  %v360_v32 = vld [vmem:[%s600_s4] ss:$0 sm:$0xff] }
  0x35   :  { %385 = vmatpush3.msra.mxu0 %v154_v33  ;;  %432 = vmatprep.subr.mxu1 %v513_v21 }
  0x36   :  { %386 = vmatprep.subr.mxu0 %v169_v35  ;;  %433 = vmatpush3.msra.mxu1 %v266_v46 }
  0x37   :  { %387 = vmatpush3.msra.mxu0 %v153_v36  ;;  %434 = vmatprep.subr.mxu1 %v513_v21 }
  0x38   :  { %388 = vmatprep.subr.mxu0 %v168_v38  ;;  %435 = vmatpush3.msra.mxu1 %v265_v47 }
  0x39   :  { %389 = vmatpush3.msra.mxu0 %v152_v39  ;;  %436 = vmatprep.subr.mxu1 %v513_v21 }
  0x3a   :  { %390 = vmatprep.subr.mxu0 %v167_v41  ;;  %437 = vmatpush3.msra.mxu1 %v264_v26 }
  0x3b   :  { %391 = vmatpush3.msra.mxu0 %v151_v42  ;;  %438 = vmatprep.subr.mxu1 %v513_v21 }
  0x3c   :  { %392 = vmatprep.subr.mxu0 %v166_v44  ;;  %439 = vmatpush3.msra.mxu1 %v263_v27 }
  0x3d   :  { %393 = vmatpush3.msra.mxu0 %v150_v45  ;;  %440 = vmatprep.subr.mxu1 %v513_v21 }
  0x3e   :  { %441 = vmatpush3.msra.mxu1 %v262_v28 }
  0x3f   :  { %442 = vmatprep.subr.mxu1 %v513_v21 }
  0x40   :  { %443 = vmatpush3.msra.mxu1 %v261_v29 }
  0x41   :  { %444 = vmatprep.subr.mxu1 %v513_v21 }
  0x42   :  { %445 = vmatpush3.msra.mxu1 %v260_v30 }
  0x98   :  { %v59_v63 = vpop.permute.xlu0 %58  ;;  %v110_v6 = vpop.permute.xlu1 %109 }
  0x99   :  { %v80_v7 = vmul.f32 %v75_v0, %v59_v63  ;;  %v81_v8 = vmul.f32 %v79_v1, %v59_v63  ;;  %v130_v13 = vmul.f32 %v125_v4, %v110_v6  ;;  %v131_v14 = vmul.f32 %v129_v5, %v110_v6 }
  0x9d   :  { %v84_v9 = vpop.permute.xlu0 %83 }
  0x9e   :  { %v104_v11 = vmul.f32 %v99_v2, %v84_v9  ;;  %v105_v12 = vmul.f32 %v103_v3, %v84_v9 }
  0xa0   :  { %v106_v15 = vadd.f32 %v104_v11, %v80_v7  ;;  %v107_v16 = vadd.f32 %v105_v12, %v81_v8 }
  0xa2   :  { %v132_v19 = vadd.f32 %v130_v13, %v106_v15  ;;  %v133_v20 = vadd.f32 %v131_v14, %v107_v16 }
  0xa4   :  { %v147_v22 = vadd.f32 %v143_v18, %v133_v20  ;;  %v146_v23 = vadd.f32 %v139_v17, %v132_v19 }
  0xa6   :  { %v149_v24 = vmax.f32 %v147_v22, 0.0  ;;  %v148_v25 = vmax.f32 %v146_v23, 0.0 }
  0xa8   :  { %253 = vmatprep.mubr.f32.mxu0 %v149_v24 }
  0xa9   :  { %254 = vmatmul.mubr.f32.vlgmr.msra.gmra.mxu0 %v148_v25 }
 0x169   :  { %v394_v31 = vpop.f32.mrf.mxu0 }
 0x16b   :  { %v395_v33 = vpop.f32.mrf.mxu0 }
 0x16c   :  { %v396_v34 = vadd.f32 %v395_v33, %v394_v31 }
 0x16e   :  { %v256_v35 = vadd.f32 %v396_v34, %v360_v32 }
 0x170   :  { %v259_v36 = vmax.f32 %v256_v35, 0.0 }
 0x172   :  { %447 = vmatmul.mubr.f32.vlgmr.msra.gmra.mxu1 %v259_v36 }
 0x232   :  { %v349_v38 = vpop.f32.mrf.mxu1 }
 0x233   :  { %v350_v39 = vadd.f32 %v361_v37, %v349_v38 }
 0x234   :  { %v448_v40 = vpop.f32.mrf.mxu1 }
 0x235   :  { %353 = vst [vmem:[%s603_s7] sm:$0xff] %v350_v39 }
 0x236   :  { %358 = vsyncpa [#allocation3], 1 }
 0x237   :  { %359 = vsyncpa [#allocation5], 1 }

</bundles_post_ra>
